<compile_context>
chip_gen: v6e
topology: v6e:2x2x1
jax: 0.10.0
libtpu: 0.0.40
codegen_flags: <defaults>
</compile_context>

<pallas_src>
import functools

import jax
import jax.numpy as jnp
from jax.experimental import pallas as pl
from jax.experimental.pallas import tpu as pltpu

LN_EPS = 1e-5  # torch.nn.LayerNorm default


def _round_up(x, m):
    return ((x + m - 1) // m) * m


def _ln_relu_epilogue(h, b, g, beta, mask, n_real, n_pad):
    """Bias + LayerNorm (stats over the real N lanes) + affine + ReLU, in f32."""
    h = h + b                                    # bias, broadcast over rows
    inv_n = 1.0 / float(n_real)
    mean = jnp.sum(h, axis=-1, keepdims=True) * inv_n
    cent = h - mean
    if n_real != n_pad:
        # W / bias are zero-padded in N, so h is exactly 0 in padded lanes;
        # only the centred value needs a single mask multiply before the var.
        cent = cent * mask
    var = jnp.sum(cent * cent, axis=-1, keepdims=True) * inv_n
    y = cent * jax.lax.rsqrt(var + LN_EPS)       # rsqrt -> EUP slot
    y = y * g + beta
    return jnp.maximum(y, 0.0)                   # ReLU (default activation_cfg)
    # TODO(synk): dropout with p>0 in train mode not implemented
    #             (p=0.0 default / eval mode => identity)


def _linear_kernel_f32out(x_ref, w_ref, b_ref, g_ref, beta_ref, mask_ref,
                          o_ref, *, n_real, n_pad):
    # f32 output: accumulate directly into the resident output block.
    k = pl.program_id(1)

    @pl.when(k == 0)
    def _():
        o_ref[...] = jnp.zeros_like(o_ref)

    o_ref[...] += jnp.dot(x_ref[...], w_ref[...],
                          preferred_element_type=jnp.float32)

    @pl.when(k == pl.num_programs(1) - 1)
    def _():
        o_ref[...] = _ln_relu_epilogue(o_ref[...], b_ref[...], g_ref[...],
                                       beta_ref[...], mask_ref[...],
                                       n_real, n_pad)


def _linear_kernel_acc(x_ref, w_ref, b_ref, g_ref, beta_ref, mask_ref,
                       o_ref, acc_ref, *, n_real, n_pad):
    # non-f32 output: f32 VMEM accumulator, cast on the final store.
    k = pl.program_id(1)

    @pl.when(k == 0)
    def _():
        acc_ref[...] = jnp.zeros_like(acc_ref)

    acc_ref[...] += jnp.dot(x_ref[...], w_ref[...],
                            preferred_element_type=jnp.float32)

    @pl.when(k == pl.num_programs(1) - 1)
    def _():
        y = _ln_relu_epilogue(acc_ref[...], b_ref[...], g_ref[...],
                              beta_ref[...], mask_ref[...], n_real, n_pad)
        o_ref[...] = y.astype(o_ref.dtype)


def _vmem_budget_bytes():
    try:
        cap = int(pltpu.get_tpu_info().vmem_capacity_bytes)
    except Exception:
        cap = 64 * 1024 * 1024            # conservative: v7x per-TC VMEM
    return int(cap * 0.8)


def prepare_params(w, b, gamma, beta):
    """Convert + pad the static parameters ONCE (keeps the per-call hot path
    free of whole-weight HBM convert/pad traffic)."""
    K, N = w.shape
    K_pad = _round_up(K, 128)
    N_pad = _round_up(N, 128)
    w_p = w.astype(jnp.bfloat16)
    if (K_pad, N_pad) != (K, N):
        w_p = jnp.pad(w_p, ((0, K_pad - K), (0, N_pad - N)))

    def pad_vec(v):
        v = v.astype(jnp.float32)
        if N_pad != N:
            v = jnp.pad(v, (0, N_pad - N))
        return v.reshape(1, N_pad)

    mask = (jnp.arange(N_pad) < N).astype(jnp.float32).reshape(1, N_pad)
    return (w_p, pad_vec(b), pad_vec(gamma), pad_vec(beta), mask, K, N)


@functools.partial(jax.jit, static_argnames=("n_out", "tm_max", "tk_max"))
def _fused_linear_padded(x, w_p, b_p, g_p, beta_p, mask, *,
                         n_out, tm_max, tk_max):
    *lead, K = x.shape
    K_pad, N_pad = w_p.shape
    N = n_out
    out_dtype = x.dtype
    out_bytes = x.dtype.itemsize

    x2 = x.reshape(-1, K).astype(jnp.bfloat16)
    M = x2.shape[0]

    # ---- tile selection -------------------------------------------------
    # tm: balance over M (minimal padding); >=2 blocks when possible so the
    # "parallel" axis feeds both TensorCores on v7x; 16-row bf16 alignment.
    tm_max = max(16, _round_up(tm_max, 16))
    n_m_blocks = pl.cdiv(M, tm_max)
    if n_m_blocks < 2 and M > 16:
        n_m_blocks = 2
    tm = min(tm_max, _round_up(pl.cdiv(M, n_m_blocks), 16))

    # tk: largest multiple of 128 that divides K_pad (no wasted K work).
    def pick_tk(limit):
        t = max(128, (min(limit, K_pad) // 128) * 128)
        while K_pad % t != 0:
            t -= 128
        return t

    tk = pick_tk(max(128, tk_max))

    def vmem_need(tm_, tk_):
        x_buf = 2 * tm_ * tk_ * 2                  # bf16, double-buffered
        w_buf = 2 * tk_ * N_pad * 2                # bf16, double-buffered
        vec = 4 * 2 * N_pad * 4                    # b / gamma / beta / mask
        out_buf = 2 * tm_ * N_pad * out_bytes
        acc = 0 if out_dtype == jnp.float32 else tm_ * N_pad * 4
        return x_buf + w_buf + vec + out_buf + acc

    budget = _vmem_budget_bytes()
    while vmem_need(tm, tk) > budget and tk > 128:   # shrink tk first (W bufs)
        tk = pick_tk(tk - 128)
    while vmem_need(tm, tk) > budget and tm > 16:    # then tm
        tm = max(16, _round_up(tm // 2, 16))

    M_pad = _round_up(M, tm)
    if M_pad != M or K_pad != K:
        x2 = jnp.pad(x2, ((0, M_pad - M), (0, K_pad - K)))

    vmem_limit = int(min(max(vmem_need(tm, tk) + (8 << 20), 32 << 20),
                         128 << 20))

    use_scratch = out_dtype != jnp.float32
    kernel = functools.partial(
        _linear_kernel_acc if use_scratch else _linear_kernel_f32out,
        n_real=N, n_pad=N_pad)
    scratch = [pltpu.VMEM((tm, N_pad), jnp.float32)] if use_scratch else []

    out = pl.pallas_call(
        kernel,
        out_shape=jax.ShapeDtypeStruct((M_pad, N_pad), out_dtype),
        grid_spec=pltpu.PrefetchScalarGridSpec(
            num_scalar_prefetch=0,
            grid=(M_pad // tm, K_pad // tk),          # reduction axis (K) last
            in_specs=[
                pl.BlockSpec((tm, tk), lambda i, k: (i, k)),      # x tile
                pl.BlockSpec((tk, N_pad), lambda i, k: (k, 0)),   # W K-slab
                pl.BlockSpec((1, N_pad), lambda i, k: (0, 0)),    # bias
                pl.BlockSpec((1, N_pad), lambda i, k: (0, 0)),    # ln gamma
                pl.BlockSpec((1, N_pad), lambda i, k: (0, 0)),    # ln beta
                pl.BlockSpec((1, N_pad), lambda i, k: (0, 0)),    # ln mask
            ],
            out_specs=pl.BlockSpec((tm, N_pad), lambda i, k: (i, 0)),
            scratch_shapes=scratch,
        ),
        compiler_params=pltpu.CompilerParams(
            dimension_semantics=("parallel", "arbitrary"),
            vmem_limit_bytes=vmem_limit,
        ),
    )(x2, w_p, b_p, g_p, beta_p, mask)

    out = out[:M, :N]
    return out.reshape(*lead, N)


def fused_linear_prepared(x, prepared, *, tm_max=512, tk_max=512):
    w_p, b_p, g_p, beta_p, mask, n_in, n_out = prepared
    assert x.shape[-1] == n_in, "input feature dim mismatch"
    return _fused_linear_padded(x, w_p, b_p, g_p, beta_p, mask,
                                n_out=n_out, tm_max=tm_max, tk_max=tk_max)


def fused_linear(x, w, b, gamma, beta, *, tm_max=512, tk_max=512):
    """x: [..., K]  w: [K, N]  b/gamma/beta: [N] -> relu(LN(x@w+b)) in x.dtype."""
    return fused_linear_prepared(x, prepare_params(w, b, gamma, beta),
                                 tm_max=tm_max, tk_max=tk_max)


def init_params(key, input_size, output_size, init_scaling=0.1):
    """Variance-scaling init (fan_in, normal), zero bias, LN gamma=1 / beta=0
    -- mirrors variance_scaling_init_linear in the PyTorch module."""
    std = (init_scaling / input_size) ** 0.5
    w = std * jax.random.normal(key, (input_size, output_size), jnp.float32)
    b = jnp.zeros((output_size,), jnp.float32)
    gamma = jnp.ones((output_size,), jnp.float32)
    beta = jnp.zeros((output_size,), jnp.float32)
    return w, b, gamma, beta


if __name__ == "__main__":
    def reference(x, w, b, gamma, beta):
        # operands rounded to bf16 to match the MXU path
        xr = x.astype(jnp.bfloat16).astype(jnp.float32)
        wr = w.astype(jnp.bfloat16).astype(jnp.float32)
        h = xr @ wr + b
        mu = h.mean(-1, keepdims=True)
        var = ((h - mu) ** 2).mean(-1, keepdims=True)
        return jnp.maximum((h - mu) * jax.lax.rsqrt(var + LN_EPS) * gamma + beta,
                           0.0)

    key = jax.random.PRNGKey(0)
    kx1, kw1, kx2, kw2 = jax.random.split(key, 4)

    # --- test 1: small aligned shapes (batch=2, seq=8, in=32, out=64), f32 ---
    b1, s1, in1, out1 = 2, 8, 32, 64
    x1 = jax.random.normal(kx1, (b1, s1, in1), jnp.float32)
    p1 = init_params(kw1, in1, out1)
    prep1 = prepare_params(*p1)                       # convert/pad W once
    y1 = jax.block_until_ready(fused_linear_prepared(x1, prep1))
    ref1 = reference(x1, *p1)
    assert y1.shape == (b1, s1, out1)
    assert float(jnp.max(jnp.abs(y1.astype(jnp.float32) - ref1))) < 1e-2

    # --- test 2: ragged shapes exercising M/K/N padding + masked LN stats ---
    b2, s2, in2, out2 = 3, 100, 200, 120
    x2 = jax.random.normal(kx2, (b2, s2, in2), jnp.float32)
    p2 = init_params(kw2, in2, out2)
    y2 = jax.block_until_ready(fused_linear(x2, *p2))
    ref2 = reference(x2, *p2)
    assert y2.shape == (b2, s2, out2)
    assert float(jnp.max(jnp.abs(y2.astype(jnp.float32) - ref2))) < 2e-2

    # --- test 3: bf16 activations / bf16 output (scratch-accumulator path) ---
    x3 = x1.astype(jnp.bfloat16)
    y3 = jax.block_until_ready(fused_linear_prepared(x3, prep1))
    assert y3.dtype == jnp.bfloat16 and y3.shape == (b1, s1, out1)
    assert float(jnp.max(jnp.abs(y3.astype(jnp.float32) - ref1))) < 5e-2

    print("KERNEL_OK")
</pallas_src>

<mosaic_0001>
module attributes {stable_mosaic.version = 11 : i64} {
  func.func @_linear_kernel_f32out(%arg0: i32, %arg1: i32, %arg2: memref<16x128xbf16, #tpu.memory_space<vmem>>, %arg3: memref<128x128xbf16, #tpu.memory_space<vmem>>, %arg4: memref<1x128xf32, #tpu.memory_space<vmem>>, %arg5: memref<1x128xf32, #tpu.memory_space<vmem>>, %arg6: memref<1x128xf32, #tpu.memory_space<vmem>>, %arg7: memref<1x128xf32, #tpu.memory_space<vmem>>, %arg8: memref<16x128xf32, #tpu.memory_space<vmem>>) attributes {dimension_semantics = [#tpu.dimension_semantics<parallel>, #tpu.dimension_semantics<arbitrary>], iteration_bounds = array<i64: 1, 1>, scalar_prefetch = 0 : i64, scratch_operands = 0 : i64, tpu.core_type = #tpu.core_type<tc>, window_params = [{transform_indices = @transform_0, window_bounds = array<i64: 16, 128>}, {transform_indices = @transform_1, window_bounds = array<i64: 128, 128>}, {pipeline_mode = #tpu.pipeline_mode<synchronous>, transform_indices = @transform_2, window_bounds = array<i64: 1, 128>}, {pipeline_mode = #tpu.pipeline_mode<synchronous>, transform_indices = @transform_3, window_bounds = array<i64: 1, 128>}, {pipeline_mode = #tpu.pipeline_mode<synchronous>, transform_indices = @transform_4, window_bounds = array<i64: 1, 128>}, {pipeline_mode = #tpu.pipeline_mode<synchronous>, transform_indices = @transform_5, window_bounds = array<i64: 1, 128>}, {transform_indices = @transform_6, window_bounds = array<i64: 16, 128>}]} {
    %c0_i32 = arith.constant 0 : i32
    %0 = arith.cmpi eq, %arg1, %c0_i32 : i32
    %1 = arith.extui %0 : i1 to i32
    %c0_i32_0 = arith.constant 0 : i32
    %2 = arith.cmpi ne, %1, %c0_i32_0 : i32
    scf.if %2 {
      %cst_10 = arith.constant 0.000000e+00 : f32
      %12 = vector.broadcast %cst_10 : f32 to vector<16x128xf32>
      %c0_11 = arith.constant 0 : index
      %c0_12 = arith.constant 0 : index
      %13 = vector.load %arg8[%c0_11, %c0_12] : memref<16x128xf32, #tpu.memory_space<vmem>>, vector<16x128xf32>
      tpu.vector_store %arg8[%c0_11, %c0_12], %12 {strides = array<i32>} : memref<16x128xf32, #tpu.memory_space<vmem>>, vector<16x128xf32>,
    } else {
    }
    %c0 = arith.constant 0 : index
    %c0_1 = arith.constant 0 : index
    %3 = vector.load %arg8[%c0, %c0_1] : memref<16x128xf32, #tpu.memory_space<vmem>>, vector<16x128xf32>
    %c0_2 = arith.constant 0 : index
    %c0_3 = arith.constant 0 : index
    %4 = vector.load %arg2[%c0_2, %c0_3] : memref<16x128xbf16, #tpu.memory_space<vmem>>, vector<16x128xbf16>
    %c0_4 = arith.constant 0 : index
    %c0_5 = arith.constant 0 : index
    %5 = vector.load %arg3[%c0_4, %c0_5] : memref<128x128xbf16, #tpu.memory_space<vmem>>, vector<128x128xbf16>
    %cst = arith.constant dense<0.000000e+00> : vector<16x128xf32>
    %6 = tpu.matmul %4, %5, %cst {dimension_numbers = #tpu.dot_dimension_numbers<[1], [0], [0], [1], [0, 0, 1, 1], [], []>} : vector<16x128xbf16>, vector<128x128xbf16>, vector<16x128xf32> -> vector<16x128xf32>
    %7 = arith.addf %3, %6 : vector<16x128xf32>
    %c0_6 = arith.constant 0 : index
    %c0_7 = arith.constant 0 : index
    %8 = vector.load %arg8[%c0_6, %c0_7] : memref<16x128xf32, #tpu.memory_space<vmem>>, vector<16x128xf32>
    tpu.vector_store %arg8[%c0_6, %c0_7], %7 {strides = array<i32>} : memref<16x128xf32, #tpu.memory_space<vmem>>, vector<16x128xf32>,
    %c0_i32_8 = arith.constant 0 : i32
    %9 = arith.cmpi eq, %arg1, %c0_i32_8 : i32
    %10 = arith.extui %9 : i1 to i32
    %c0_i32_9 = arith.constant 0 : i32
    %11 = arith.cmpi ne, %10, %c0_i32_9 : i32
    scf.if %11 {
      %c0_10 = arith.constant 0 : index
      %c0_11 = arith.constant 0 : index
      %12 = vector.load %arg8[%c0_10, %c0_11] : memref<16x128xf32, #tpu.memory_space<vmem>>, vector<16x128xf32>
      %c0_12 = arith.constant 0 : index
      %c0_13 = arith.constant 0 : index
      %13 = vector.load %arg4[%c0_12, %c0_13] : memref<1x128xf32, #tpu.memory_space<vmem>>, vector<1x128xf32>
      %c0_14 = arith.constant 0 : index
      %c0_15 = arith.constant 0 : index
      %14 = vector.load %arg5[%c0_14, %c0_15] : memref<1x128xf32, #tpu.memory_space<vmem>>, vector<1x128xf32>
      %c0_16 = arith.constant 0 : index
      %c0_17 = arith.constant 0 : index
      %15 = vector.load %arg6[%c0_16, %c0_17] : memref<1x128xf32, #tpu.memory_space<vmem>>, vector<1x128xf32>
      %c0_18 = arith.constant 0 : index
      %c0_19 = arith.constant 0 : index
      %16 = vector.load %arg7[%c0_18, %c0_19] : memref<1x128xf32, #tpu.memory_space<vmem>>, vector<1x128xf32>
      %17 = vector.broadcast %13 : vector<1x128xf32> to vector<16x128xf32>
      %18 = arith.addf %12, %17 : vector<16x128xf32>
      %cst_20 = arith.constant dense<0.000000e+00> : vector<16xf32>
      %19 = vector.multi_reduction <add>, %18, %cst_20 [1] : vector<16x128xf32> to vector<16xf32>
      %20 = vector.shape_cast %19 : vector<16xf32> to vector<16x1xf32>
      %cst_21 = arith.constant 1.562500e-02 : f32
      %21 = vector.broadcast %cst_21 : f32 to vector<16x1xf32>
      %22 = arith.mulf %20, %21 : vector<16x1xf32>
      %23 = vector.broadcast %22 : vector<16x1xf32> to vector<16x128xf32>
      %24 = arith.subf %18, %23 : vector<16x128xf32>
      %25 = vector.broadcast %16 : vector<1x128xf32> to vector<16x128xf32>
      %26 = arith.mulf %24, %25 : vector<16x128xf32>
      %27 = arith.mulf %26, %26 : vector<16x128xf32>
      %cst_22 = arith.constant dense<0.000000e+00> : vector<16xf32>
      %28 = vector.multi_reduction <add>, %27, %cst_22 [1] : vector<16x128xf32> to vector<16xf32>
      %29 = vector.shape_cast %28 : vector<16xf32> to vector<16x1xf32>
      %cst_23 = arith.constant 1.562500e-02 : f32
      %30 = vector.broadcast %cst_23 : f32 to vector<16x1xf32>
      %31 = arith.mulf %29, %30 : vector<16x1xf32>
      %cst_24 = arith.constant 9.99999974E-6 : f32
      %32 = vector.broadcast %cst_24 : f32 to vector<16x1xf32>
      %33 = arith.addf %31, %32 : vector<16x1xf32>
      %34 = math.rsqrt %33 : vector<16x1xf32>
      %35 = vector.broadcast %34 : vector<16x1xf32> to vector<16x128xf32>
      %36 = arith.mulf %26, %35 : vector<16x128xf32>
      %37 = vector.broadcast %14 : vector<1x128xf32> to vector<16x128xf32>
      %38 = arith.mulf %36, %37 : vector<16x128xf32>
      %39 = vector.broadcast %15 : vector<1x128xf32> to vector<16x128xf32>
      %40 = arith.addf %38, %39 : vector<16x128xf32>
      %cst_25 = arith.constant 0.000000e+00 : f32
      %41 = vector.broadcast %cst_25 : f32 to vector<16x128xf32>
      %42 = arith.maximumf %40, %41 : vector<16x128xf32>
      %c0_26 = arith.constant 0 : index
      %c0_27 = arith.constant 0 : index
      %43 = vector.load %arg8[%c0_26, %c0_27] : memref<16x128xf32, #tpu.memory_space<vmem>>, vector<16x128xf32>
      tpu.vector_store %arg8[%c0_26, %c0_27], %42 {strides = array<i32>} : memref<16x128xf32, #tpu.memory_space<vmem>>, vector<16x128xf32>,
    } else {
    }
    return
  }
  func.func @transform_0(%arg0: i32, %arg1: i32) -> (i32, i32) {
    %c0_i32 = arith.constant 0 : i32
    return %arg0, %arg1 : i32, i32
  }
  func.func @transform_1(%arg0: i32, %arg1: i32) -> (i32, i32) {
    %c0_i32 = arith.constant 0 : i32
    %c0_i32_0 = arith.constant 0 : i32
    return %arg1, %c0_i32 : i32, i32
  }
  func.func @transform_2(%arg0: i32, %arg1: i32) -> (i32, i32) {
    %c0_i32 = arith.constant 0 : i32
    %c0_i32_0 = arith.constant 0 : i32
    %c0_i32_1 = arith.constant 0 : i32
    return %c0_i32, %c0_i32_0 : i32, i32
  }
  func.func @transform_3(%arg0: i32, %arg1: i32) -> (i32, i32) {
    %c0_i32 = arith.constant 0 : i32
    %c0_i32_0 = arith.constant 0 : i32
    %c0_i32_1 = arith.constant 0 : i32
    return %c0_i32, %c0_i32_0 : i32, i32
  }
  func.func @transform_4(%arg0: i32, %arg1: i32) -> (i32, i32) {
    %c0_i32 = arith.constant 0 : i32
    %c0_i32_0 = arith.constant 0 : i32
    %c0_i32_1 = arith.constant 0 : i32
    return %c0_i32, %c0_i32_0 : i32, i32
  }
  func.func @transform_5(%arg0: i32, %arg1: i32) -> (i32, i32) {
    %c0_i32 = arith.constant 0 : i32
    %c0_i32_0 = arith.constant 0 : i32
    %c0_i32_1 = arith.constant 0 : i32
    return %c0_i32, %c0_i32_0 : i32, i32
  }
  func.func @transform_6(%arg0: i32, %arg1: i32) -> (i32, i32) {
    %c0_i32 = arith.constant 0 : i32
    %c0_i32_0 = arith.constant 0 : i32
    return %arg0, %c0_i32 : i32, i32
  }
}

</mosaic_0001>

<bundles_post_ra>
// kernel: _fused_linear_padded.1
= control target key start
LH: loop header
LB: loop body
LE: loop exit
PB: predicated region body
PF: predicated region fallthrough
CT: control target
= control target key end

     0   :  { %11 = vsyncpa [#allocation3], 0  ;;  %s317_s21 = smov [#allocation2]   ;;  %s381_s0 = inlined_call_operand.vmem [shape: bf16[16,128], index: 0, kind: input, shape index: {}]   ;;  %s382_s1 = inlined_call_operand.hbm [shape: bf16[128,128], index: 1, kind: input, shape index: {}]   ;;  %s383_s2 = inlined_call_operand.vmem [shape: f32[1,128], index: 2, kind: input, shape index: {}]   ;;  %s384_s3 = inlined_call_operand.vmem [shape: f32[1,128], index: 3, kind: input, shape index: {}]   ;;  %s385_s4 = inlined_call_operand.vmem [shape: f32[1,128], index: 4, kind: input, shape index: {}]   ;;  %s386_s5 = inlined_call_operand.vmem [shape: f32[1,128], index: 5, kind: input, shape index: {}]   ;;  %s387_s6 = inlined_call_operand.vmem [shape: f32[16,128], index: 6, kind: output, shape index: {}]  }
   0x1   :  { %s19_s22 = sshll.u32 %s317_s21, 4  ;;  %s20_s22 = int_to_ptr.vmem [resolvable:$true] %s19_s22 }
   0x2   :  { %s303_s23 = scalar_lea.vmem %s20_s22, 1024  ;;  %p308_p1 = scmp.lt.s32.totalorder %s20_s22, %s20_s22 }
   0x3   :  { %p304_p0 = scmp.ne.s32.totalorder %s20_s22, %s303_s23  ;;  %p309_p2 = scmp.lt.s32.totalorder %s303_s23, %s303_s23 }
   0x5   :  { %p310_p3 = por %p309_p2, %p308_p1 }
   0x7   :  { %p311_p4 = pnand %p310_p3, %p304_p0 }
   0x9   :  { %314 = shalt.err (!%p311_p4)
}
   0xa   :  { %s318_s24 = smov 64   ;;  %s319_s25 = smov 4  }
   0xb   :  { %25 = dma.hbm_to_vmem [thread:$0]  %s382_s1, 1024, %s20_s22, [#allocation3], %s318_s24, %s318_s24, %s319_s25  }
   0xc   :  { %315 = dma.done.wait [#allocation3], 1024  }
   0xd   :  { %316 = vsyncadd [#allocation3], 4294966272  ;;  %v320_v0 = vmov 0.0   ;;  %vm321_vm0 = vmmov 0   ;;  %v282_v1 = vld [vmem:[#allocation2 + $0x38] sm:$0xff]   ;;  %v283_v2 = vld [vmem:[#allocation2 + $0x30] sm:$0xff]  }
   0xe   :  { %257 = vmatprep.subr.bf16.mxu0 %v320_v0  ;;  %273 = vmatprep.mubr.msk.bf16.mxu0 %vm321_vm0, %v320_v0  ;;  %v284_v3 = vld [vmem:[#allocation2 + $0x28] sm:$0xff]   ;;  %v285_v4 = vld [vmem:[#allocation2 + $0x20] sm:$0xff]   ;;  %v286_v5 = vld [vmem:[#allocation2 + $0x18] sm:$0xff]  }
   0xf   :  { %258 = vmatpush3.bf16.msra.mxu0 %v282_v1  ;;  %v287_v6 = vld [vmem:[#allocation2 + $0x10] sm:$0xff]   ;;  %v288_v7 = vld [vmem:[#allocation2 + $0x8] sm:$0xff]   ;;  %v289_v8 = vld [vmem:[#allocation2] sm:$0xff]  }
  0x10   :  { %259 = vmatprep.subr.bf16.mxu0 %v320_v0  ;;  %v290_v9 = vld [vmem:[%s381_s0] sm:$0xff]  }
  0x11   :  { %v244_v11 = vld [vmem:[%s383_s2] ss:$0 sm:$0xff] }
  0x12   :  { %v245_v19 = vld [vmem:[%s386_s5] ss:$0 sm:$0xff] }
  0x13   :  { %260 = vmatpush3.bf16.msra.mxu0 %v283_v2  ;;  %v246_v35 = vld [vmem:[%s384_s3] ss:$0 sm:$0xff] }
  0x14   :  { %261 = vmatprep.subr.bf16.mxu0 %v320_v0  ;;  %v247_v37 = vld [vmem:[%s385_s4] ss:$0 sm:$0xff] }
  0x17   :  { %262 = vmatpush3.bf16.msra.mxu0 %v284_v3 }
  0x18   :  { %263 = vmatprep.subr.bf16.mxu0 %v320_v0 }
  0x1b   :  { %264 = vmatpush3.bf16.msra.mxu0 %v285_v4 }
  0x1c   :  { %265 = vmatprep.subr.bf16.mxu0 %v320_v0 }
  0x1f   :  { %266 = vmatpush3.bf16.msra.mxu0 %v286_v5 }
  0x20   :  { %267 = vmatprep.subr.bf16.mxu0 %v320_v0 }
  0x23   :  { %268 = vmatpush3.bf16.msra.mxu0 %v287_v6 }
  0x24   :  { %269 = vmatprep.subr.bf16.mxu0 %v320_v0 }
  0x27   :  { %270 = vmatpush3.bf16.msra.mxu0 %v288_v7 }
  0x28   :  { %271 = vmatprep.subr.bf16.mxu0 %v320_v0 }
  0x2b   :  { %272 = vmatpush3.bf16.msra.mxu0 %v289_v8 }
  0x2e   :  { %274 = vmatmul.mubr.bf16.vlgmr.msra.gmra.mxu0 %v290_v9 }
  0xee   :  { %v152_v10 = vpop.f32.mrf.mxu0 }
  0xef   :  { %v178_v13 = vadd.f32 %v244_v11, %v152_v10 }
  0xf0   :  { %v275_v12 = vpop.f32.mrf.mxu0 }
  0xf1   :  { %180 = vadd.xlane.f32.xlu0 %v178_v13 }
  0xf2   :  { %v155_v14 = vpop.f32.mrf.mxu0 }
  0xf3   :  { %v179_v16 = vadd.f32 %v244_v11, %v155_v14 }
  0xf4   :  { %v276_v15 = vpop.f32.mrf.mxu0 }
  0xf5   :  { %182 = vadd.xlane.f32.xlu0 %v179_v16 }
 0x17a   :  { %v181_v17 = vpop.xlane.xlu0 %180 }
 0x17b   :  { %v184_v18 = vmul.f32 0.015625, %v181_v17 }
 0x17d   :  { %v186_v20 = vsub.f32 %v178_v13, %v184_v18 }
 0x17e   :  { %v183_v21 = vpop.xlane.xlu0 %182 }
 0x17f   :  { %v185_v22 = vmul.f32 0.015625, %v183_v21  ;;  %v194_v23 = vmul.f32 %v245_v19, %v186_v20 }
 0x181   :  { %v187_v24 = vsub.f32 %v179_v16, %v185_v22  ;;  %v196_v25 = vmul.f32 %v194_v23, %v194_v23 }
 0x183   :  { %198 = vadd.xlane.f32.xlu1 %v196_v25  ;;  %v195_v26 = vmul.f32 %v245_v19, %v187_v24 }
 0x185   :  { %v197_v27 = vmul.f32 %v195_v26, %v195_v26 }
 0x187   :  { %200 = vadd.xlane.f32.xlu1 %v197_v27 }
 0x20c   :  { %v199_v28 = vpop.xlane.xlu1 %198 }
 0x20d   :  { %v202_v29 = vmul.f32 0.015625, %v199_v28 }
 0x20f   :  { %v204_v30 = vadd.f32 1e-05, %v202_v29 }
 0x210   :  { %v201_v31 = vpop.xlane.xlu1 %200 }
 0x211   :  { %291 = vrsqrt.f32 %v204_v30  ;;  %v203_v32 = vmul.f32 0.015625, %v201_v31 }
 0x213   :  { %v205_v33 = vadd.f32 1e-05, %v203_v32 }
 0x215   :  { %293 = vrsqrt.f32 %v205_v33 }
 0x21e   :  { %v292_v34 = vpop.eup %291 }
 0x21f   :  { %v208_v36 = vmul.f32 %v292_v34, %v194_v23 }
 0x221   :  { %v216_v38 = vmul.f32 %v246_v35, %v208_v36 }
 0x222   :  { %v294_v39 = vpop.eup %293 }
 0x223   :  { %v224_v40 = vadd.f32 %v247_v37, %v216_v38  ;;  %v209_v41 = vmul.f32 %v294_v39, %v195_v26 }
 0x225   :  { %v226_v42 = vmax.f32 %v224_v40, 0.0  ;;  %v217_v43 = vmul.f32 %v246_v35, %v209_v41 }
 0x227   :  { %228 = vst [vmem:[%s387_s6] sm:$0xff] %v226_v42  ;;  %v225_v44 = vadd.f32 %v247_v37, %v217_v43 }
 0x229   :  { %v227_v45 = vmax.f32 %v225_v44, 0.0 }
 0x22b   :  { %229 = vst [vmem:[%s387_s6 + $0x8] sm:$0xff] %v227_v45 }
 0x22c   :  { %234 = vsyncpa [#allocation3], 1 }

</bundles_post_ra>
